<compile_context>
chip_gen: v5e
topology: v5e:2x2
jax: 0.10.0
libtpu: 0.0.40
codegen_flags: <defaults>
</compile_context>

<pallas_src>
import math

import jax
import jax.numpy as jnp
from jax.experimental import pallas as pl
from jax.experimental.pallas import tpu as pltpu

WIDERESNET_WIDTH_WANG2023 = 10
IN_DIM = 64 * WIDERESNET_WIDTH_WANG2023   # 640
LATENT_DIM = 128
HID_DIM = LATENT_DIM * 3                  # 384
OUT_DIM = LATENT_DIM                      # 128

MAX_TILE_B = 2048  # ~19 MiB double-buffered working set at f32 x; fine everywhere


def _round_up_16(n: int) -> int:
    return max(16, ((n + 15) // 16) * 16)


def _choose_tile_b(B: int) -> int:
    """Batch tile: multiple of 16, single tile for small B, otherwise an even
    number of near-equal steps (balances the two v7x TensorCores)."""
    if B <= MAX_TILE_B:
        return _round_up_16(B)
    steps = pl.cdiv(B, MAX_TILE_B)
    if steps % 2:
        steps += 1
    return _round_up_16(pl.cdiv(B, steps))


def _var_head_kernel(x_ref, w1_ref, b1_ref, w2_ref, b2_ref, o_ref):
    # Cast x to the MXU dtype in-register (no extra HBM pass in the wrapper).
    x = x_ref[...].astype(w1_ref.dtype)
    # fc1 + ReLU : MXU matmul with f32 accumulation.
    h = jnp.dot(x, w1_ref[...], preferred_element_type=jnp.float32)
    h = jnp.maximum(h + b1_ref[...], 0.0)          # (TILE_B, HID) + (1, HID), f32
    # fc2 + logsigmoid : cast hidden back to the matmul dtype for the MXU.
    z = jnp.dot(h.astype(w2_ref.dtype), w2_ref[...],
                preferred_element_type=jnp.float32)
    z = z + b2_ref[...]
    # numerically stable logsigmoid(z) = min(z, 0) - log1p(exp(-|z|))
    out = jnp.minimum(z, 0.0) - jnp.log1p(jnp.exp(-jnp.abs(z)))
    o_ref[...] = out.astype(o_ref.dtype)


def prepare_params(w1, b1, w2, b2, *, weight_dtype=jnp.bfloat16):
    """Cast/reshape params ONCE into the kernel layout (do this at init, not per call)."""
    return (w1.astype(weight_dtype),
            b1.reshape(1, HID_DIM).astype(jnp.float32),
            w2.astype(weight_dtype),
            b2.reshape(1, OUT_DIM).astype(jnp.float32))


def wrn2810_var_head(x, w1, b1, w2, b2, *, weight_dtype=jnp.bfloat16,
                     out_dtype=None, tile_b=None):
    """x: (B, 640); params either raw ((640,384),(384,),(384,128),(128,)) or
    already produced by prepare_params()."""
    B = x.shape[0]
    out_dtype = x.dtype if out_dtype is None else out_dtype
    if tile_b is None:
        tile_b = _choose_tile_b(B)
    grid = (pl.cdiv(B, tile_b),)

    # Only prepare if the caller passed raw params (prefer prepare_params() once).
    if w1.dtype != weight_dtype or b1.ndim != 2:
        w1, b1, w2, b2 = prepare_params(w1, b1, w2, b2, weight_dtype=weight_dtype)

    itemsize = lambda a: jnp.dtype(a.dtype).itemsize
    cost = pl.CostEstimate(
        flops=2 * B * (IN_DIM * HID_DIM + HID_DIM * OUT_DIM),
        transcendentals=2 * B * OUT_DIM,  # exp + log1p per output element
        bytes_accessed=(x.size * itemsize(x)
                        + w1.size * itemsize(w1) + w2.size * itemsize(w2)
                        + b1.size * 4 + b2.size * 4
                        + B * OUT_DIM * jnp.dtype(out_dtype).itemsize),
    )

    return pl.pallas_call(
        _var_head_kernel,
        out_shape=jax.ShapeDtypeStruct((B, OUT_DIM), out_dtype),
        grid_spec=pl.GridSpec(
            grid=grid,
            in_specs=[
                pl.BlockSpec((tile_b, IN_DIM), lambda i: (i, 0)),    # x tile (native dtype)
                pl.BlockSpec((IN_DIM, HID_DIM), lambda i: (0, 0)),   # W1 (grid-invariant)
                pl.BlockSpec((1, HID_DIM), lambda i: (0, 0)),        # b1
                pl.BlockSpec((HID_DIM, OUT_DIM), lambda i: (0, 0)),  # W2 (grid-invariant)
                pl.BlockSpec((1, OUT_DIM), lambda i: (0, 0)),        # b2
            ],
            # OUT_DIM == 128 -> lane-dense, unmasked stores; do not sub-tile it.
            out_specs=pl.BlockSpec((tile_b, OUT_DIM), lambda i: (i, 0)),
        ),
        compiler_params=pltpu.CompilerParams(
            dimension_semantics=("parallel",),
            # v5e's default scoped-VMEM limit (16 MiB) would clamp large tiles.
            vmem_limit_bytes=(48 << 20) if tile_b >= 1024 else None,
        ),
        cost_estimate=cost,
    )(x, w1, b1, w2, b2)


def init_params(key):
    """Deterministic init mimicking nn.Linear defaults (uniform(-1/sqrt(fan_in), +))."""
    k1, k2, k3, k4 = jax.random.split(key, 4)
    bound1 = 1.0 / math.sqrt(IN_DIM)
    bound2 = 1.0 / math.sqrt(HID_DIM)
    # stored transposed: (in, out)
    w1 = jax.random.uniform(k1, (IN_DIM, HID_DIM), jnp.float32, -bound1, bound1)
    b1 = jax.random.uniform(k2, (HID_DIM,), jnp.float32, -bound1, bound1)
    w2 = jax.random.uniform(k3, (HID_DIM, OUT_DIM), jnp.float32, -bound2, bound2)
    b2 = jax.random.uniform(k4, (OUT_DIM,), jnp.float32, -bound2, bound2)
    return w1, b1, w2, b2


def reference(x, w1, b1, w2, b2):
    h = jnp.maximum(x @ w1 + b1, 0.0)
    z = h @ w2 + b2
    return jnp.minimum(z, 0.0) - jnp.log1p(jnp.exp(-jnp.abs(z)))


if __name__ == "__main__":
    key = jax.random.PRNGKey(0)
    kx, kp = jax.random.split(key)
    w1, b1, w2, b2 = init_params(kp)

    # Prepared-once params (bf16 weights, f32 row-vector biases) and f32 copies.
    p_bf16 = prepare_params(w1, b1, w2, b2, weight_dtype=jnp.bfloat16)
    p_f32 = prepare_params(w1, b1, w2, b2, weight_dtype=jnp.float32)

    # --- small batch, single tile ---
    B = 16
    x = jax.random.normal(kx, (B, IN_DIM), jnp.float32)
    ref = reference(x, w1, b1, w2, b2)

    out_bf16 = jax.block_until_ready(wrn2810_var_head(x, *p_bf16))
    assert out_bf16.shape == (B, OUT_DIM)
    assert jnp.allclose(out_bf16, ref, atol=5e-2, rtol=5e-2), "bf16 path mismatch"

    out_f32 = jax.block_until_ready(
        wrn2810_var_head(x, *p_f32, weight_dtype=jnp.float32))
    assert jnp.allclose(out_f32, ref, atol=1e-5, rtol=1e-5), "f32 path mismatch"

    # --- ragged batch: B not a multiple of tile_b (exercises masked last-block store) ---
    Br = 50
    xr = jax.random.normal(jax.random.PRNGKey(1), (Br, IN_DIM), jnp.float32)
    refr = reference(xr, w1, b1, w2, b2)
    out_r = jax.block_until_ready(wrn2810_var_head(xr, *p_bf16, tile_b=16))
    assert out_r.shape == (Br, OUT_DIM)
    assert jnp.all(jnp.isfinite(out_r)), "ragged path produced non-finite values"
    assert jnp.allclose(out_r, refr, atol=5e-2, rtol=5e-2), "ragged bf16 path mismatch"

    # --- bf16 output option (halves store traffic) ---
    out_bf16_out = jax.block_until_ready(
        wrn2810_var_head(x, *p_bf16, out_dtype=jnp.bfloat16))
    assert out_bf16_out.dtype == jnp.bfloat16
    assert jnp.allclose(out_bf16_out.astype(jnp.float32), ref, atol=8e-2, rtol=8e-2)

    print("KERNEL_OK")
</pallas_src>

<mosaic_0001>
module attributes {stable_mosaic.version = 11 : i64} {
  func.func @_var_head_kernel(%arg0: i32, %arg1: memref<16x640xf32, #tpu.memory_space<vmem>>, %arg2: memref<640x384xbf16, #tpu.memory_space<vmem>>, %arg3: memref<1x384xf32, #tpu.memory_space<vmem>>, %arg4: memref<384x128xbf16, #tpu.memory_space<vmem>>, %arg5: memref<1x128xf32, #tpu.memory_space<vmem>>, %arg6: memref<16x128xf32, #tpu.memory_space<vmem>>) attributes {dimension_semantics = [#tpu.dimension_semantics<parallel>], iteration_bounds = array<i64: 1>, scalar_prefetch = 0 : i64, scratch_operands = 0 : i64, tpu.core_type = #tpu.core_type<tc>, window_params = [{transform_indices = @transform_0, window_bounds = array<i64: 16, 640>}, {pipeline_mode = #tpu.pipeline_mode<synchronous>, transform_indices = @transform_1, window_bounds = array<i64: 640, 384>}, {pipeline_mode = #tpu.pipeline_mode<synchronous>, transform_indices = @transform_2, window_bounds = array<i64: 1, 384>}, {pipeline_mode = #tpu.pipeline_mode<synchronous>, transform_indices = @transform_3, window_bounds = array<i64: 384, 128>}, {pipeline_mode = #tpu.pipeline_mode<synchronous>, transform_indices = @transform_4, window_bounds = array<i64: 1, 128>}, {transform_indices = @transform_5, window_bounds = array<i64: 16, 128>}]} {
    %c0 = arith.constant 0 : index
    %c0_0 = arith.constant 0 : index
    %0 = vector.load %arg1[%c0, %c0_0] : memref<16x640xf32, #tpu.memory_space<vmem>>, vector<16x640xf32>
    %1 = arith.truncf %0 : vector<16x640xf32> to vector<16x640xbf16>
    %c0_1 = arith.constant 0 : index
    %c0_2 = arith.constant 0 : index
    %2 = vector.load %arg2[%c0_1, %c0_2] : memref<640x384xbf16, #tpu.memory_space<vmem>>, vector<640x384xbf16>
    %cst = arith.constant dense<0.000000e+00> : vector<16x384xf32>
    %3 = tpu.matmul %1, %2, %cst {dimension_numbers = #tpu.dot_dimension_numbers<[1], [0], [0], [1], [0, 0, 1, 1], [], []>} : vector<16x640xbf16>, vector<640x384xbf16>, vector<16x384xf32> -> vector<16x384xf32>
    %c0_3 = arith.constant 0 : index
    %c0_4 = arith.constant 0 : index
    %4 = vector.load %arg3[%c0_3, %c0_4] : memref<1x384xf32, #tpu.memory_space<vmem>>, vector<1x384xf32>
    %5 = vector.broadcast %4 : vector<1x384xf32> to vector<16x384xf32>
    %6 = arith.addf %3, %5 : vector<16x384xf32>
    %cst_5 = arith.constant 0.000000e+00 : f32
    %7 = vector.broadcast %cst_5 : f32 to vector<16x384xf32>
    %8 = arith.maximumf %6, %7 : vector<16x384xf32>
    %9 = arith.truncf %8 : vector<16x384xf32> to vector<16x384xbf16>
    %c0_6 = arith.constant 0 : index
    %c0_7 = arith.constant 0 : index
    %10 = vector.load %arg4[%c0_6, %c0_7] : memref<384x128xbf16, #tpu.memory_space<vmem>>, vector<384x128xbf16>
    %cst_8 = arith.constant dense<0.000000e+00> : vector<16x128xf32>
    %11 = tpu.matmul %9, %10, %cst_8 {dimension_numbers = #tpu.dot_dimension_numbers<[1], [0], [0], [1], [0, 0, 1, 1], [], []>} : vector<16x384xbf16>, vector<384x128xbf16>, vector<16x128xf32> -> vector<16x128xf32>
    %c0_9 = arith.constant 0 : index
    %c0_10 = arith.constant 0 : index
    %12 = vector.load %arg5[%c0_9, %c0_10] : memref<1x128xf32, #tpu.memory_space<vmem>>, vector<1x128xf32>
    %13 = vector.broadcast %12 : vector<1x128xf32> to vector<16x128xf32>
    %14 = arith.addf %11, %13 : vector<16x128xf32>
    %cst_11 = arith.constant 0.000000e+00 : f32
    %15 = vector.broadcast %cst_11 : f32 to vector<16x128xf32>
    %16 = arith.minimumf %14, %15 : vector<16x128xf32>
    %17 = math.absf %14 : vector<16x128xf32>
    %cst_12 = arith.constant 0.000000e+00 : f32
    %18 = vector.broadcast %cst_12 : f32 to vector<16x128xf32>
    %19 = arith.subf %18, %17 : vector<16x128xf32>
    %20 = math.exp %19 : vector<16x128xf32>
    %21 = math.log1p %20 : vector<16x128xf32>
    %22 = arith.subf %16, %21 : vector<16x128xf32>
    %c0_13 = arith.constant 0 : index
    %c0_14 = arith.constant 0 : index
    %23 = vector.load %arg6[%c0_13, %c0_14] : memref<16x128xf32, #tpu.memory_space<vmem>>, vector<16x128xf32>
    tpu.vector_store %arg6[%c0_13, %c0_14], %22 {strides = array<i32>} : memref<16x128xf32, #tpu.memory_space<vmem>>, vector<16x128xf32>,
    return
  }
  func.func @transform_0(%arg0: i32) -> (i32, i32) {
    %c0_i32 = arith.constant 0 : i32
    %c0_i32_0 = arith.constant 0 : i32
    return %arg0, %c0_i32 : i32, i32
  }
  func.func @transform_1(%arg0: i32) -> (i32, i32) {
    %c0_i32 = arith.constant 0 : i32
    %c0_i32_0 = arith.constant 0 : i32
    %c0_i32_1 = arith.constant 0 : i32
    return %c0_i32, %c0_i32_0 : i32, i32
  }
  func.func @transform_2(%arg0: i32) -> (i32, i32) {
    %c0_i32 = arith.constant 0 : i32
    %c0_i32_0 = arith.constant 0 : i32
    %c0_i32_1 = arith.constant 0 : i32
    return %c0_i32, %c0_i32_0 : i32, i32
  }
  func.func @transform_3(%arg0: i32) -> (i32, i32) {
    %c0_i32 = arith.constant 0 : i32
    %c0_i32_0 = arith.constant 0 : i32
    %c0_i32_1 = arith.constant 0 : i32
    return %c0_i32, %c0_i32_0 : i32, i32
  }
  func.func @transform_4(%arg0: i32) -> (i32, i32) {
    %c0_i32 = arith.constant 0 : i32
    %c0_i32_0 = arith.constant 0 : i32
    %c0_i32_1 = arith.constant 0 : i32
    return %c0_i32, %c0_i32_0 : i32, i32
  }
  func.func @transform_5(%arg0: i32) -> (i32, i32) {
    %c0_i32 = arith.constant 0 : i32
    %c0_i32_0 = arith.constant 0 : i32
    return %arg0, %c0_i32 : i32, i32
  }
}

</mosaic_0001>

<bundles_post_ra>
// kernel: tpu_custom_call.1
= control target key start
LH: loop header
LB: loop body
LE: loop exit
PB: predicated region body
PF: predicated region fallthrough
CT: control target
= control target key end

     0   :  { %10 = vsyncpa [#allocation3], 0  ;;  %s2376_s0 = inlined_call_operand.hbm [shape: f32[16,640], index: 0, kind: input, shape index: {}]   ;;  %s2377_s1 = inlined_call_operand.hbm [shape: bf16[640,384], index: 1, kind: input, shape index: {}]   ;;  %s2378_s2 = inlined_call_operand.hbm [shape: f32[1,384], index: 2, kind: input, shape index: {}]   ;;  %s2379_s3 = inlined_call_operand.hbm [shape: bf16[384,128], index: 3, kind: input, shape index: {}]   ;;  %s2380_s4 = inlined_call_operand.vmem [shape: f32[1,128], index: 4, kind: input, shape index: {}]   ;;  %s2381_s5 = inlined_call_operand.hbm [shape: f32[16,128], index: 5, kind: output, shape index: {}]  }
   0x1   :  { %11 = vsyncpa [#allocation6], 0 }
   0x2   :  { %12 = vsyncpa [#allocation9], 0  ;;  %s31_s20 = sshll.u32 %s2377_s1, 4  ;;  %s32_s20 = int_to_ptr.hbm [resolvable:$true] %s31_s20 }
   0x3   :  { %13 = vsyncpa [#allocation4], 0  ;;  %s2285_s21 = smov [#allocation5]   ;;  %s18_s25 = sshll.u32 %s2376_s0, 4  ;;  %s19_s25 = int_to_ptr.hbm [resolvable:$true] %s18_s25 }
   0x4   :  { %s33_s22 = sshll.u32 %s2285_s21, 4  ;;  %s2286_s26 = smov 192   ;;  %s34_s22 = int_to_ptr.vmem [resolvable:$true] %s33_s22 }
   0x5   :  { %s2287_s27 = smov 12   ;;  %s2288_s28 = smov [#allocation2]  }
   0x6   :  { %39 = dma.hbm_to_vmem [thread:$0]  %s32_s20, 15360, %s34_s22, [#allocation6], %s2286_s26, %s2286_s26, %s2287_s27  }
   0x7   :  { %s20_s29 = sshll.u32 %s2288_s28, 4  ;;  %s2289_s30 = smov 640   ;;  %s21_s29 = int_to_ptr.vmem [resolvable:$true] %s20_s29 }
   0x8   :  { %s2290_s6 = smov 40   ;;  %s45_s8 = sshll.u32 %s2378_s2, 4  ;;  %s46_s8 = int_to_ptr.hbm [resolvable:$true] %s45_s8 }
   0x9   :  { %26 = dma.hbm_to_vmem [thread:$0]  %s19_s25, 1280, %s21_s29, [#allocation3], %s2289_s30, %s2289_s30, %s2290_s6  }
   0xa   :  { %s2291_s9 = smov [#allocation7]   ;;  %s55_s12 = sshll.u32 %s2379_s3, 4  ;;  %s56_s12 = int_to_ptr.hbm [resolvable:$true] %s55_s12 }
   0xb   :  { %s47_s10 = sshll.u32 %s2291_s9, 4  ;;  %s2292_s13 = smov [#allocation8]   ;;  %s48_s10 = int_to_ptr.vmem [resolvable:$true] %s47_s10 }
   0xc   :  { %50 = dma.hbm_to_vmem [thread:$0]  %s46_s8, 48, %s48_s10, [#allocation6]  }
   0xd   :  { %s57_s14 = sshll.u32 %s2292_s13, 4  ;;  %s2293_s15 = smov 64   ;;  %s58_s14 = int_to_ptr.vmem [resolvable:$true] %s57_s14 }
   0xe   :  { %s2294_s16 = smov 4  }
   0xf   :  { %63 = dma.hbm_to_vmem [thread:$0]  %s56_s12, 3072, %s58_s14, [#allocation9], %s2293_s15, %s2293_s15, %s2294_s16  }
  0x10   :  { %2277 = dma.done.wait [#allocation3], 1280  }
  0x11   :  { %2278 = vsyncadd [#allocation3], 4294966016 }
  0x12   :  { %2279 = dma.done.wait [#allocation6], 15408  }
  0x13   :  { %2280 = vsyncadd [#allocation6], 4294951888 }
  0x14   :  { %2281 = dma.done.wait [#allocation9], 3072  }
  0x15   :  { %2282 = vsyncadd [#allocation9], 4294964224  ;;  %v1501_v0 = vld [vmem:[#allocation5 + $0xa8] sm:$0xf]  ;;  %v2013_v1 = vld [vmem:[#allocation5 + $0xb0] sm:$0xf0] }
  0x16   :  { %v1597_v2 = vld [vmem:[#allocation5 + $0x168] sm:$0xf]  ;;  %v1502_v3 = vor.u32 %v2013_v1, %v1501_v0  ;;  %v2037_v4 = vld [vmem:[#allocation5 + $0x170] sm:$0xf0]  ;;  %v1489_v9 = vld [vmem:[#allocation5 + $0x90] sm:$0xf] }
  0x17   :  { %v1693_v5 = vld [vmem:[#allocation5 + $0x228] sm:$0xf]  ;;  %v2061_v6 = vld [vmem:[#allocation5 + $0x230] sm:$0xf0]  ;;  %v1598_v7 = vor.u32 %v2037_v4, %v1597_v2  ;;  %v2010_v10 = vld [vmem:[#allocation5 + $0x98] sm:$0xf0] }
  0x18   :  { %v1694_v8 = vor.u32 %v2061_v6, %v1693_v5  ;;  %v1585_v11 = vld [vmem:[#allocation5 + $0x150] sm:$0xf]  ;;  %905 = vmatpush.bf16.msra.mxu0 %v1502_v3  ;;  %v1490_v12 = vor.u32 %v2010_v10, %v1489_v9  ;;  %v2034_v13 = vld [vmem:[#allocation5 + $0x158] sm:$0xf0]  ;;  %v1789_v18 = vld [vmem:[#allocation5 + $0x2e8] sm:$0xf] }
  0x19   :  { %v1681_v14 = vld [vmem:[#allocation5 + $0x210] sm:$0xf]  ;;  %v2058_v15 = vld [vmem:[#allocation5 + $0x218] sm:$0xf0]  ;;  %919 = vmatpush.bf16.msra.mxu1 %v1598_v7  ;;  %v1586_v16 = vor.u32 %v2034_v13, %v1585_v11  ;;  %v2085_v19 = vld [vmem:[#allocation5 + $0x2f0] sm:$0xf0] }
  0x1a   :  { %933 = vmatpush.bf16.msra.mxu2 %v1694_v8  ;;  %v1682_v17 = vor.u32 %v2058_v15, %v1681_v14  ;;  %v1477_v20 = vld [vmem:[#allocation5 + $0x78] sm:$0xf]  ;;  %v1790_v21 = vor.u32 %v2085_v19, %v1789_v18  ;;  %v2007_v22 = vld [vmem:[#allocation5 + $0x80] sm:$0xf0]  ;;  %v1777_v27 = vld [vmem:[#allocation5 + $0x2d0] sm:$0xf] }
  0x1b   :  { %v1573_v23 = vld [vmem:[#allocation5 + $0x138] sm:$0xf]  ;;  %v2031_v24 = vld [vmem:[#allocation5 + $0x140] sm:$0xf0]  ;;  %v1478_v28 = vor.u32 %v2007_v22, %v1477_v20  ;;  %v2082_v29 = vld [vmem:[#allocation5 + $0x2d8] sm:$0xf0] }
  0x1c   :  { %v1669_v25 = vld [vmem:[#allocation5 + $0x1f8] sm:$0xf]  ;;  %v2055_v26 = vld [vmem:[#allocation5 + $0x200] sm:$0xf0]  ;;  %906 = vmatpush.bf16.msra.mxu0 %v1490_v12  ;;  %947 = vmatpush.bf16.msra.mxu3 %v1790_v21  ;;  %v1465_v30 = vld [vmem:[#allocation5 + $0x60] sm:$0xf]  ;;  %v1574_v32 = vor.u32 %v2031_v24, %v1573_v23  ;;  %v1778_v34 = vor.u32 %v2082_v29, %v1777_v27 }
  0x1d   :  { %v2004_v31 = vld [vmem:[#allocation5 + $0x68] sm:$0xf0]  ;;  %920 = vmatpush.bf16.msra.mxu1 %v1586_v16  ;;  %v1670_v33 = vor.u32 %v2055_v26, %v1669_v25  ;;  %v1561_v35 = vld [vmem:[#allocation5 + $0x120] sm:$0xf]  ;;  %v1765_v39 = vld [vmem:[#allocation5 + $0x2b8] sm:$0xf] }
  0x1e   :  { %934 = vmatpush.bf16.msra.mxu2 %v1682_v17  ;;  %v2028_v36 = vld [vmem:[#allocation5 + $0x128] sm:$0xf0]  ;;  %v1657_v37 = vld [vmem:[#allocation5 + $0x1e0] sm:$0xf]  ;;  %v2079_v40 = vld [vmem:[#allocation5 + $0x2c0] sm:$0xf0]  ;;  %v1466_v41 = vor.u32 %v2004_v31, %v1465_v30 }
  0x1f   :  { %v2052_v38 = vld [vmem:[#allocation5 + $0x1e8] sm:$0xf0]  ;;  %v1766_v42 = vor.u32 %v2079_v40, %v1765_v39  ;;  %v1453_v43 = vld [vmem:[#allocation5 + $0x48] sm:$0xf]  ;;  %v2001_v44 = vld [vmem:[#allocation5 + $0x50] sm:$0xf0]  ;;  %v1562_v45 = vor.u32 %v2028_v36, %v1561_v35 }
  0x20   :  { %907 = vmatpush.bf16.msra.mxu0 %v1478_v28  ;;  %948 = vmatpush.bf16.msra.mxu3 %v1778_v34  ;;  %v1658_v46 = vor.u32 %v2052_v38, %v1657_v37  ;;  %v1549_v47 = vld [vmem:[#allocation5 + $0x108] sm:$0xf]  ;;  %v1753_v48 = vld [vmem:[#allocation5 + $0x2a0] sm:$0xf]  ;;  %v2076_v49 = vld [vmem:[#allocation5 + $0x2a8] sm:$0xf0]  ;;  %v1454_v53 = vor.u32 %v2001_v44, %v1453_v43 }
  0x21   :  { %921 = vmatpush.bf16.msra.mxu1 %v1574_v32  ;;  %v2025_v50 = vld [vmem:[#allocation5 + $0x110] sm:$0xf0]  ;;  %v1645_v51 = vld [vmem:[#allocation5 + $0x1c8] sm:$0xf]  ;;  %v1754_v54 = vor.u32 %v2076_v49, %v1753_v48  ;;  %v1441_v55 = vld [vmem:[#allocation5 + $0x30] sm:$0xf] }
  0x22   :  { %935 = vmatpush.bf16.msra.mxu2 %v1670_v33  ;;  %v2049_v52 = vld [vmem:[#allocation5 + $0x1d0] sm:$0xf0]  ;;  %v1998_v56 = vld [vmem:[#allocation5 + $0x38] sm:$0xf0]  ;;  %v1550_v57 = vor.u32 %v2025_v50, %v1549_v47  ;;  %v1537_v59 = vld [vmem:[#allocation5 + $0xf0] sm:$0xf] }
  0x23   :  { %v1646_v58 = vor.u32 %v2049_v52, %v1645_v51  ;;  %v1741_v60 = vld [vmem:[#allocation5 + $0x288] sm:$0xf]  ;;  %v2073_v61 = vld [vmem:[#allocation5 + $0x290] sm:$0xf0]  ;;  %v2022_v62 = vld [vmem:[#allocation5 + $0xf8] sm:$0xf0]  ;;  %v1442_v1 = vor.u32 %v1998_v56, %v1441_v55 }
  0x24   :  { %908 = vmatpush.bf16.msra.mxu0 %v1466_v41  ;;  %949 = vmatpush.bf16.msra.mxu3 %v1766_v42  ;;  %v1633_v63 = vld [vmem:[#allocation5 + $0x1b0] sm:$0xf]  ;;  %v2046_v0 = vld [vmem:[#allocation5 + $0x1b8] sm:$0xf0]  ;;  %v1742_v2 = vor.u32 %v2073_v61, %v1741_v60  ;;  %v1429_v3 = vld [vmem:[#allocation5 + $0x18] sm:$0xf]  ;;  %v1538_v5 = vor.u32 %v2022_v62, %v1537_v59 }
  0x25   :  { %922 = vmatpush.bf16.msra.mxu1 %v1562_v45  ;;  %v1995_v4 = vld [vmem:[#allocation5 + $0x20] sm:$0xf0]  ;;  %v1634_v6 = vor.u32 %v2046_v0, %v1633_v63  ;;  %v1525_v7 = vld [vmem:[#allocation5 + $0xd8] sm:$0xf]  ;;  %v1729_v8 = vld [vmem:[#allocation5 + $0x270] sm:$0xf] }
  0x26   :  { %936 = vmatpush.bf16.msra.mxu2 %v1658_v46  ;;  %v2070_v9 = vld [vmem:[#allocation5 + $0x278] sm:$0xf0]  ;;  %v2019_v10 = vld [vmem:[#allocation5 + $0xe0] sm:$0xf0]  ;;  %v1621_v11 = vld [vmem:[#allocation5 + $0x198] sm:$0xf]  ;;  %v1430_v13 = vor.u32 %v1995_v4, %v1429_v3 }
  0x27   :  { %v2043_v12 = vld [vmem:[#allocation5 + $0x1a0] sm:$0xf0]  ;;  %v1730_v14 = vor.u32 %v2070_v9, %v1729_v8  ;;  %v1417_v15 = vld [vmem:[#allocation5] sm:$0xf]  ;;  %v1992_v16 = vld [vmem:[#allocation5 + $0x8] sm:$0xf0]  ;;  %v1526_v18 = vor.u32 %v2019_v10, %v1525_v7 }
  0x28   :  { %909 = vmatpush.bf16.msra.mxu0 %v1454_v53  ;;  %950 = vmatpush.bf16.msra.mxu3 %v1754_v54  ;;  %v1513_v17 = vld [vmem:[#allocation5 + $0xc0] sm:$0xf]  ;;  %v1622_v19 = vor.u32 %v2043_v12, %v1621_v11  ;;  %v2016_v20 = vld [vmem:[#allocation5 + $0xc8] sm:$0xf0]  ;;  %v1717_v21 = vld [vmem:[#allocation5 + $0x258] sm:$0xf]  ;;  %v1418_v29 = vor.u32 %v1992_v16, %v1417_v15 }
  0x29   :  { %923 = vmatpush.bf16.msra.mxu1 %v1550_v57  ;;  %v2067_v22 = vld [vmem:[#allocation5 + $0x260] sm:$0xf0]  ;;  %v1609_v23 = vld [vmem:[#allocation5 + $0x180] sm:$0xf]  ;;  %v2040_v24 = vld [vmem:[#allocation5 + $0x188] sm:$0xf0]  ;;  %v1514_v33 = vor.u32 %v2016_v20, %v1513_v17 }
  0x2a   :  { %937 = vmatpush.bf16.msra.mxu2 %v1646_v58  ;;  %v1885_v25 = vld [vmem:[#allocation5 + $0x3a8] sm:$0xf]  ;;  %v2109_v26 = vld [vmem:[#allocation5 + $0x3b0] sm:$0xf0]  ;;  %v2012_v27 = vld [vmem:[#allocation5 + $0xac] sm:$0xf]  ;;  %v1718_v32 = vor.u32 %v2067_v22, %v1717_v21  ;;  %v1610_v34 = vor.u32 %v2040_v24, %v1609_v23 }
  0x2b   :  { %v1503_v28 = vld [vmem:[#allocation5 + $0xb4] sm:$0xf0]  ;;  %v2036_v30 = vld [vmem:[#allocation5 + $0x16c] sm:$0xf]  ;;  %v1873_v35 = vld [vmem:[#allocation5 + $0x390] sm:$0xf]  ;;  %v1886_v38 = vor.u32 %v2109_v26, %v1885_v25 }
  0x2c   :  { %910 = vmatpush.bf16.msra.mxu0 %v1442_v1  ;;  %951 = vmatpush.bf16.msra.mxu3 %v1742_v2  ;;  %v1599_v31 = vld [vmem:[#allocation5 + $0x174] sm:$0xf0]  ;;  %v1705_v36 = vld [vmem:[#allocation5 + $0x240] sm:$0xf]  ;;  %v2064_v37 = vld [vmem:[#allocation5 + $0x248] sm:$0xf0]  ;;  %v1506_v39 = vor.u32 %v2012_v27, %v1503_v28 }
  0x2d   :  { %924 = vmatpush.bf16.msra.mxu1 %v1538_v5  ;;  %v2106_v40 = vld [vmem:[#allocation5 + $0x398] sm:$0xf0]  ;;  %v2060_v41 = vld [vmem:[#allocation5 + $0x22c] sm:$0xf]  ;;  %v1695_v42 = vld [vmem:[#allocation5 + $0x234] sm:$0xf0]  ;;  %v1602_v43 = vor.u32 %v2036_v30, %v1599_v31  ;;  %v1706_v49 = vor.u32 %v2064_v37, %v1705_v36 }
  0x2e   :  { %938 = vmatpush.bf16.msra.mxu2 %v1634_v6  ;;  %v2009_v44 = vld [vmem:[#allocation5 + $0x94] sm:$0xf]  ;;  %v1491_v45 = vld [vmem:[#allocation5 + $0x9c] sm:$0xf0]  ;;  %v87_v50 = vld [vmem:[#allocation2 + $0x28] sm:$0xff]  ;;  %v1698_v51 = vor.u32 %v2060_v41, %v1695_v42  ;;  %v1874_v53 = vor.u32 %v2106_v40, %v1873_v35  ;;  %s1400_s20 = sshll.u32 %s2381_s5, 4  ;;  %s1401_s20 = int_to_ptr.hbm [resolvable:$true] %s1400_s20 }
  0x2f   :  { %v82_v46 = vld [vmem:[#allocation2] sm:$0xff]  ;;  %v1587_v48 = vld [vmem:[#allocation5 + $0x15c] sm:$0xf0]  ;;  %v1494_v54 = vor.u32 %v2009_v44, %v1491_v45  ;;  %v1861_v55 = vld [vmem:[#allocation5 + $0x378] sm:$0xf]  ;;  %s2296_s21 = smov 128  }
  0x30   :  { %911 = vmatpush.bf16.msra.mxu0 %v1430_v13  ;;  %952 = vmatpush.bf16.msra.mxu3 %v1730_v14  ;;  %v2033_v47 = vld [vmem:[#allocation5 + $0x154] sm:$0xf]  ;;  %v2340_v52 = vpack.c.bf16 %v87_v50, %v82_v46  ;;  %v1683_v57 = vld [vmem:[#allocation5 + $0x21c] sm:$0xf0]  ;;  %v2103_v59 = vld [vmem:[#allocation5 + $0x380] sm:$0xf0] }
  0x31   :  { %925 = vmatpush.bf16.msra.mxu1 %v1526_v18  ;;  %v2057_v56 = vld [vmem:[#allocation5 + $0x214] sm:$0xf]  ;;  %v1590_v58 = vor.u32 %v2033_v47, %v1587_v48  ;;  %v2006_v60 = vld [vmem:[#allocation5 + $0x7c] sm:$0xf]  ;;  %v1479_v61 = vld [vmem:[#allocation5 + $0x84] sm:$0xf0]  ;;  %v1862_v5 = vor.u32 %v2103_v59, %v1861_v55 }
  0x32   :  { %939 = vmatpush.bf16.msra.mxu2 %v1622_v19  ;;  %v2030_v62 = vld [vmem:[#allocation5 + $0x13c] sm:$0xf]  ;;  %v1575_v63 = vld [vmem:[#allocation5 + $0x144] sm:$0xf0]  ;;  %v1686_v0 = vor.u32 %v2057_v56, %v1683_v57  ;;  %v1849_v1 = vld [vmem:[#allocation5 + $0x360] sm:$0xf]  ;;  %v1482_v6 = vor.u32 %v2006_v60, %v1479_v61 }
  0x33   :  { %v2054_v2 = vld [vmem:[#allocation5 + $0x1fc] sm:$0xf]  ;;  %v1671_v3 = vld [vmem:[#allocation5 + $0x204] sm:$0xf0]  ;;  %v84_v4 = vld [vmem:[#allocation2 + $0x10] sm:$0xff]  ;;  %v1578_v10 = vor.u32 %v2030_v62, %v1575_v63  ;;  %s2297_s22 = smov 8  }
  0x34   :  { %912 = vmatpush.bf16.msra.mxu0 %v1418_v29  ;;  %953 = vmatpush.bf16.msra.mxu3 %v1718_v32  ;;  %v89_v7 = vld [vmem:[#allocation2 + $0x38] sm:$0xff]  ;;  %v90_v9 = vld [vmem:[#allocation2 + $0x40] sm:$0xff]  ;;  %v2003_v12 = vld [vmem:[#allocation5 + $0x64] sm:$0xf]  ;;  %v1674_v18 = vor.u32 %v2054_v2, %v1671_v3 }
  0x35   :  { %926 = vmatpush.bf16.msra.mxu1 %v1514_v33  ;;  %v85_v8 = vld [vmem:[#allocation2 + $0x18] sm:$0xff]  ;;  %v1467_v13 = vld [vmem:[#allocation5 + $0x6c] sm:$0xf0]  ;;  %v2343_v14 = vpack.c.bf16 %v89_v7, %v84_v4  ;;  %v2027_v16 = vld [vmem:[#allocation5 + $0x124] sm:$0xf] }
  0x36   :  { %940 = vmatpush.bf16.msra.mxu2 %v1610_v34  ;;  %v2100_v11 = vld [vmem:[#allocation5 + $0x368] sm:$0xf0]  ;;  %v2345_v15 = vpack.c.bf16 %v90_v9, %v85_v8  ;;  %v1563_v17 = vld [vmem:[#allocation5 + $0x12c] sm:$0xf0]  ;;  %v1837_v19 = vld [vmem:[#allocation5 + $0x348] sm:$0xf]  ;;  %v1470_v22 = vor.u32 %v2003_v12, %v1467_v13 }
  0x37   :  { %913 = vmatmul.bf16.vlgmr.msra.gmra.mxu0 %v2340_v52  ;;  %v83_v20 = vld [vmem:[#allocation2 + $0x8] sm:$0xff]  ;;  %v1850_v21 = vor.u32 %v2100_v11, %v1849_v1  ;;  %v2051_v23 = vld [vmem:[#allocation5 + $0x1e4] sm:$0xf]  ;;  %v1659_v24 = vld [vmem:[#allocation5 + $0x1ec] sm:$0xf0]  ;;  %v1566_v26 = vor.u32 %v2027_v16, %v1563_v17 }
  0x38   :  { %961 = vmatpush.bf16.msrb.mxu0 %v1886_v38  ;;  %954 = vmatpush.bf16.msra.mxu3 %v1706_v49  ;;  %v88_v25 = vld [vmem:[#allocation2 + $0x30] sm:$0xff]  ;;  %v2097_v27 = vld [vmem:[#allocation5 + $0x350] sm:$0xf0]  ;;  %v2000_v28 = vld [vmem:[#allocation5 + $0x4c] sm:$0xf]  ;;  %v1662_v33 = vor.u32 %v2051_v23, %v1659_v24 }
  0x39   :  { %975 = vmatpush.bf16.msrb.mxu1 %v1506_v39  ;;  %941 = vmatmul.bf16.vlgmr.msra.gmra.mxu2 %v2343_v14  ;;  %v1455_v29 = vld [vmem:[#allocation5 + $0x54] sm:$0xf0]  ;;  %v2349_v30 = vpack.c.bf16 %v88_v25, %v83_v20  ;;  %v2024_v31 = vld [vmem:[#allocation5 + $0x10c] sm:$0xf]  ;;  %v1838_v34 = vor.u32 %v2097_v27, %v1837_v19  ;;  %v1825_v36 = vld [vmem:[#allocation5 + $0x330] sm:$0xf] }
  0x3a   :  { %989 = vmatpush.bf16.msrb.mxu2 %v1602_v43  ;;  %v1551_v32 = vld [vmem:[#allocation5 + $0x114] sm:$0xf0]  ;;  %v1458_v35 = vor.u32 %v2000_v28, %v1455_v29  ;;  %v2048_v37 = vld [vmem:[#allocation5 + $0x1cc] sm:$0xf]  ;;  %v2094_v40 = vld [vmem:[#allocation5 + $0x338] sm:$0xf0] }
  0x3b   :  { %955 = vmatmul.bf16.vlgmr.msra.gmra.mxu3 %v2345_v15  ;;  %927 = vmatmul.bf16.vlgmr.msra.gmra.mxu1 %v2349_v30  ;;  %v1647_v38 = vld [vmem:[#allocation5 + $0x1d4] sm:$0xf0]  ;;  %v1554_v39 = vor.u32 %v2024_v31, %v1551_v32  ;;  %v1997_v41 = vld [vmem:[#allocation5 + $0x34] sm:$0xf]  ;;  %v1443_v42 = vld [vmem:[#allocation5 + $0x3c] sm:$0xf0]  ;;  %v1826_v46 = vor.u32 %v2094_v40, %v1825_v36 }
  0x3c   :  { %1003 = vmatpush.bf16.msrb.mxu3 %v1698_v51  ;;  %962 = vmatpush.bf16.msrb.mxu0 %v1874_v53  ;;  %v2021_v43 = vld [vmem:[#allocation5 + $0xf4] sm:$0xf]  ;;  %v1539_v44 = vld [vmem:[#allocation5 + $0xfc] sm:$0xf0]  ;;  %v1650_v45 = vor.u32 %v2048_v37, %v1647_v38  ;;  %v1446_v47 = vor.u32 %v1997_v41, %v1443_v42  ;;  %v1813_v48 = vld [vmem:[#allocation5 + $0x318] sm:$0xf] }
  0x3d   :  { %976 = vmatpush.bf16.msrb.mxu1 %v1494_v54  ;;  %v2045_v49 = vld [vmem:[#allocation5 + $0x1b4] sm:$0xf]  ;;  %v1635_v50 = vld [vmem:[#allocation5 + $0x1bc] sm:$0xf0]  ;;  %v1542_v51 = vor.u32 %v2021_v43, %v1539_v44  ;;  %v2091_v53 = vld [vmem:[#allocation5 + $0x320] sm:$0xf0] }
  0x3e   :  { %990 = vmatpush.bf16.msrb.mxu2 %v1590_v58  ;;  %v1994_v54 = vld [vmem:[#allocation5 + $0x1c] sm:$0xf]  ;;  %v1431_v55 = vld [vmem:[#allocation5 + $0x24] sm:$0xf0]  ;;  %v1638_v58 = vor.u32 %v2045_v49, %v1635_v50  ;;  %v1801_v59 = vld [vmem:[#allocation5 + $0x300] sm:$0xf]  ;;  %v1814_v62 = vor.u32 %v2091_v53, %v1813_v48 }
  0x3f   :  { %v2018_v56 = vld [vmem:[#allocation5 + $0xdc] sm:$0xf]  ;;  %v1527_v57 = vld [vmem:[#allocation5 + $0xe4] sm:$0xf0]  ;;  %v2088_v60 = vld [vmem:[#allocation5 + $0x308] sm:$0xf0]  ;;  %v1434_v63 = vor.u32 %v1994_v54, %v1431_v55 }
  0x40   :  { %1004 = vmatpush.bf16.msrb.mxu3 %v1686_v0  ;;  %963 = vmatpush.bf16.msrb.mxu0 %v1862_v5  ;;  %v1991_v61 = vld [vmem:[#allocation5 + $0x4] sm:$0xf]  ;;  %v1419_v0 = vld [vmem:[#allocation5 + $0xc] sm:$0xf0]  ;;  %v2042_v1 = vld [vmem:[#allocation5 + $0x19c] sm:$0xf]  ;;  %v1530_v3 = vor.u32 %v2018_v56, %v1527_v57  ;;  %v1802_v16 = vor.u32 %v2088_v60, %v1801_v59 }
  0x41   :  { %977 = vmatpush.bf16.msrb.mxu1 %v1482_v6  ;;  %v1623_v2 = vld [vmem:[#allocation5 + $0x1a4] sm:$0xf0]  ;;  %v2015_v4 = vld [vmem:[#allocation5 + $0xc4] sm:$0xf]  ;;  %v1515_v5 = vld [vmem:[#allocation5 + $0xcc] sm:$0xf0]  ;;  %v1422_v17 = vor.u32 %v1991_v61, %v1419_v0 }
  0x42   :  { %991 = vmatpush.bf16.msrb.mxu2 %v1578_v10  ;;  %v2084_v6 = vld [vmem:[#allocation5 + $0x2ec] sm:$0xf]  ;;  %v1791_v7 = vld [vmem:[#allocation5 + $0x2f4] sm:$0xf0]  ;;  %v1509_v10 = vld [vmem:[#allocation5 + $0xb0] sm:$0xf]  ;;  %v1626_v13 = vor.u32 %v2042_v1, %v1623_v2 }
  0x43   :  { %v2108_v8 = vld [vmem:[#allocation5 + $0x3ac] sm:$0xf]  ;;  %v1887_v9 = vld [vmem:[#allocation5 + $0x3b4] sm:$0xf0]  ;;  %v2014_v11 = vld [vmem:[#allocation5 + $0xb8] sm:$0xf0] }
  0x44   :  { %1005 = vmatpush.bf16.msrb.mxu3 %v1674_v18  ;;  %964 = vmatpush.bf16.msrb.mxu0 %v1850_v21  ;;  %v86_v12 = vld [vmem:[#allocation2 + $0x20] sm:$0xff]  ;;  %v91_v18 = vld [vmem:[#allocation2 + $0x48] sm:$0xff]  ;;  %v2039_v19 = vld [vmem:[#allocation5 + $0x184] sm:$0xf]  ;;  %v1518_v21 = vor.u32 %v2015_v4, %v1515_v5  ;;  %v1890_v25 = vor.u32 %v2108_v8, %v1887_v9 }
  0x45   :  { %978 = vmatpush.bf16.msrb.mxu1 %v1470_v22  ;;  %v1611_v20 = vld [vmem:[#allocation5 + $0x18c] sm:$0xf0]  ;;  %v1794_v22 = vor.u32 %v2084_v6, %v1791_v7  ;;  %v2038_v24 = vld [vmem:[#allocation5 + $0x178] sm:$0xf0]  ;;  %v2081_v27 = vld [vmem:[#allocation5 + $0x2d4] sm:$0xf]  ;;  %v2352_v31 = vpack.c.bf16 %v91_v18, %v86_v12 }
  0x46   :  { %992 = vmatpush.bf16.msrb.mxu2 %v1566_v26  ;;  %v1605_v23 = vld [vmem:[#allocation5 + $0x170] sm:$0xf]  ;;  %v1510_v26 = vor.u32 %v2014_v11, %v1509_v10  ;;  %v1779_v28 = vld [vmem:[#allocation5 + $0x2dc] sm:$0xf0]  ;;  %v2105_v29 = vld [vmem:[#allocation5 + $0x394] sm:$0xf] }
  0x47   :  { %v1875_v32 = vld [vmem:[#allocation5 + $0x39c] sm:$0xf0]  ;;  %v1606_v36 = vor.u32 %v2038_v24, %v1605_v23  ;;  %v1782_v37 = vor.u32 %v2081_v27, %v1779_v28  ;;  %v1593_v38 = vld [vmem:[#allocation5 + $0x158] sm:$0xf]  ;;  %v2078_v42 = vld [vmem:[#allocation5 + $0x2bc] sm:$0xf] }
  0x48   :  { %1006 = vmatpush.bf16.msrb.mxu3 %v1662_v33  ;;  %965 = vmatpush.bf16.msrb.mxu0 %v1838_v34  ;;  %v1497_v33 = vld [vmem:[#allocation5 + $0x98] sm:$0xf]  ;;  %v2011_v34 = vld [vmem:[#allocation5 + $0xa0] sm:$0xf0]  ;;  %v1878_v40 = vor.u32 %v2105_v29, %v1875_v32  ;;  %v1767_v43 = vld [vmem:[#allocation5 + $0x2c4] sm:$0xf0] }
  0x49   :  { %979 = vmatpush.bf16.msrb.mxu1 %v1458_v35  ;;  %v1614_v35 = vor.u32 %v2039_v19, %v1611_v20  ;;  %v1498_v41 = vor.u32 %v2011_v34, %v1497_v33  ;;  %v2102_v44 = vld [vmem:[#allocation5 + $0x37c] sm:$0xf]  ;;  %v1770_v49 = vor.u32 %v2078_v42, %v1767_v43  ;;  %v1581_v50 = vld [vmem:[#allocation5 + $0x140] sm:$0xf]  ;;  %v2075_v55 = vld [vmem:[#allocation5 + $0x2a4] sm:$0xf] }
  0x4a   :  { %993 = vmatpush.bf16.msrb.mxu2 %v1554_v39  ;;  %v2035_v39 = vld [vmem:[#allocation5 + $0x160] sm:$0xf0]  ;;  %v1755_v56 = vld [vmem:[#allocation5 + $0x2ac] sm:$0xf0]  ;;  %v1473_v59 = vld [vmem:[#allocation5 + $0x68] sm:$0xf] }
  0x4b   :  { %v1594_v48 = vor.u32 %v2035_v39, %v1593_v38  ;;  %v2099_v57 = vld [vmem:[#allocation5 + $0x364] sm:$0xf]  ;;  %v2005_v60 = vld [vmem:[#allocation5 + $0x70] sm:$0xf0]  ;;  %v1743_v4 = vld [vmem:[#allocation5 + $0x294] sm:$0xf0] }
  0x4c   :  { %1007 = vmatpush.bf16.msrb.mxu3 %v1650_v45  ;;  %966 = vmatpush.bf16.msrb.mxu0 %v1826_v46  ;;  %v1863_v45 = vld [vmem:[#allocation5 + $0x384] sm:$0xf0]  ;;  %v1485_v46 = vld [vmem:[#allocation5 + $0x80] sm:$0xf]  ;;  %v2029_v0 = vld [vmem:[#allocation5 + $0x130] sm:$0xf0]  ;;  %v1474_v2 = vor.u32 %v2005_v60, %v1473_v59 }
  0x4d   :  { %980 = vmatpush.bf16.msrb.mxu1 %v1446_v47  ;;  %v2008_v47 = vld [vmem:[#allocation5 + $0x88] sm:$0xf0]  ;;  %v1866_v53 = vor.u32 %v2102_v44, %v1863_v45  ;;  %v1839_v6 = vld [vmem:[#allocation5 + $0x354] sm:$0xf0]  ;;  %v1461_v7 = vld [vmem:[#allocation5 + $0x50] sm:$0xf] }
  0x4e   :  { %994 = vmatpush.bf16.msrb.mxu2 %v1542_v51  ;;  %v2032_v51 = vld [vmem:[#allocation5 + $0x148] sm:$0xf0]  ;;  %v1486_v54 = vor.u32 %v2008_v47, %v1485_v46  ;;  %v2002_v8 = vld [vmem:[#allocation5 + $0x58] sm:$0xf0]  ;;  %v1557_v11 = vld [vmem:[#allocation5 + $0x110] sm:$0xf] }
  0x4f   :  { %v1582_v61 = vor.u32 %v2032_v51, %v1581_v50  ;;  %v2096_v5 = vld [vmem:[#allocation5 + $0x34c] sm:$0xf]  ;;  %v2026_v12 = vld [vmem:[#allocation5 + $0x118] sm:$0xf0]  ;;  %v1731_v18 = vld [vmem:[#allocation5 + $0x27c] sm:$0xf0] }
  0x50   :  { %1008 = vmatpush.bf16.msrb.mxu3 %v1638_v58  ;;  %967 = vmatpush.bf16.msrb.mxu0 %v1814_v62  ;;  %v1851_v58 = vld [vmem:[#allocation5 + $0x36c] sm:$0xf0]  ;;  %v1758_v62 = vor.u32 %v2075_v55, %v1755_v56  ;;  %v2093_v19 = vld [vmem:[#allocation5 + $0x334] sm:$0xf]  ;;  %v1827_v20 = vld [vmem:[#allocation5 + $0x33c] sm:$0xf0]  ;;  %v1558_v23 = vor.u32 %v2026_v12, %v1557_v11 }
  0x51   :  { %981 = vmatpush.bf16.msrb.mxu1 %v1434_v63  ;;  %v1569_v63 = vld [vmem:[#allocation5 + $0x128] sm:$0xf]  ;;  %v1854_v1 = vor.u32 %v2099_v57, %v1851_v58  ;;  %v2023_v27 = vld [vmem:[#allocation5 + $0x100] sm:$0xf0]  ;;  %v1830_v28 = vor.u32 %v2093_v19, %v1827_v20  ;;  %v2090_v33 = vld [vmem:[#allocation5 + $0x31c] sm:$0xf] }
  0x52   :  { %995 = vmatpush.bf16.msrb.mxu2 %v1530_v3  ;;  %v2072_v3 = vld [vmem:[#allocation5 + $0x28c] sm:$0xf]  ;;  %v1570_v9 = vor.u32 %v2029_v0, %v1569_v63  ;;  %v1719_v32 = vld [vmem:[#allocation5 + $0x264] sm:$0xf0]  ;;  %v2063_v39 = vld [vmem:[#allocation5 + $0x244] sm:$0xf] }
  0x53   :  { %v1746_v10 = vor.u32 %v2072_v3, %v1743_v4  ;;  %v1815_v34 = vld [vmem:[#allocation5 + $0x324] sm:$0xf0]  ;;  %v1707_v44 = vld [vmem:[#allocation5 + $0x24c] sm:$0xf0]  ;;  %v2087_v45 = vld [vmem:[#allocation5 + $0x304] sm:$0xf] }
  0x54   :  { %1009 = vmatpush.bf16.msrb.mxu3 %v1626_v13  ;;  %968 = vmatpush.bf16.msrb.mxu0 %v1802_v16  ;;  %v1842_v13 = vor.u32 %v2096_v5, %v1839_v6  ;;  %v1462_v16 = vor.u32 %v2002_v8, %v1461_v7  ;;  %v1818_v42 = vor.u32 %v2090_v33, %v1815_v34  ;;  %v1803_v46 = vld [vmem:[#allocation5 + $0x30c] sm:$0xf0]  ;;  %v1425_v47 = vld [vmem:[#allocation5 + $0x8] sm:$0xf]  ;;  %v2062_v50 = vld [vmem:[#allocation5 + $0x238] sm:$0xf0] }
  0x55   :  { %982 = vmatpush.bf16.msrb.mxu1 %v1422_v17  ;;  %v2069_v17 = vld [vmem:[#allocation5 + $0x274] sm:$0xf]  ;;  %v1797_v51 = vld [vmem:[#allocation5 + $0x2f0] sm:$0xf]  ;;  %v1710_v55 = vor.u32 %v2063_v39, %v1707_v44  ;;  %v2110_v57 = vld [vmem:[#allocation5 + $0x3b8] sm:$0xf0]  ;;  %v1806_v58 = vor.u32 %v2087_v45, %v1803_v46 }
  0x56   :  { %996 = vmatpush.bf16.msrb.mxu2 %v1518_v21  ;;  %v1449_v21 = vld [vmem:[#allocation5 + $0x38] sm:$0xf]  ;;  %v1734_v24 = vor.u32 %v2069_v17, %v1731_v18  ;;  %v1893_v56 = vld [vmem:[#allocation5 + $0x3b0] sm:$0xf]  ;;  %v1521_v60 = vld [vmem:[#allocation5 + $0xc8] sm:$0xf] }
  0x57   :  { %969 = vmatmul.bf16.vlgmr.msrb.gmra.mxu0 %v2352_v31  ;;  %v1689_v0 = vld [vmem:[#allocation5 + $0x218] sm:$0xf]  ;;  %v2083_v4 = vld [vmem:[#allocation5 + $0x2e0] sm:$0xf0]  ;;  %v2056_v12 = vld [vmem:[#allocation5 + $0x208] sm:$0xf0] }
  0x58   :  { %1017 = vmatpush.bf16.msra.mxu0 %v1794_v22  ;;  %1010 = vmatpush.bf16.msrb.mxu3 %v1614_v35  ;;  %v1999_v22 = vld [vmem:[#allocation5 + $0x40] sm:$0xf0]  ;;  %v1437_v35 = vld [vmem:[#allocation5 + $0x20] sm:$0xf]  ;;  %v1785_v3 = vld [vmem:[#allocation5 + $0x2d8] sm:$0xf] }
  0x59   :  { %1031 = vmatpush.bf16.msra.mxu1 %v1890_v25  ;;  %997 = vmatmul.bf16.vlgmr.msrb.gmra.mxu2 %v2349_v30  ;;  %v2066_v25 = vld [vmem:[#allocation5 + $0x25c] sm:$0xf]  ;;  %v1450_v29 = vor.u32 %v1999_v22, %v1449_v21  ;;  %v1881_v5 = vld [vmem:[#allocation5 + $0x398] sm:$0xf]  ;;  %v2107_v6 = vld [vmem:[#allocation5 + $0x3a0] sm:$0xf0] }
  0x5a   :  { %1045 = vmatpush.bf16.msra.mxu2 %v1510_v26  ;;  %983 = vmatmul.bf16.vlgmr.msrb.gmra.mxu1 %v2340_v52  ;;  %v1545_v26 = vld [vmem:[#allocation5 + $0xf8] sm:$0xf]  ;;  %v1722_v38 = vor.u32 %v2066_v25, %v1719_v32  ;;  %v1882_v11 = vor.u32 %v2107_v6, %v1881_v5  ;;  %v1869_v17 = vld [vmem:[#allocation5 + $0x380] sm:$0xf]  ;;  %v2104_v18 = vld [vmem:[#allocation5 + $0x388] sm:$0xf0] }
  0x5b   :  { %1011 = vmatmul.bf16.vlgmr.msrb.gmra.mxu3 %v2343_v14  ;;  %v1665_v21 = vld [vmem:[#allocation5 + $0x1e8] sm:$0xf]  ;;  %v1870_v22 = vor.u32 %v2104_v18, %v1869_v17  ;;  %v2077_v25 = vld [vmem:[#allocation5 + $0x2b0] sm:$0xf0]  ;;  %v1653_v32 = vld [vmem:[#allocation5 + $0x1d0] sm:$0xf] }
  0x5c   :  { %1059 = vmatpush.bf16.msra.mxu3 %v1606_v36  ;;  %1018 = vmatpush.bf16.msra.mxu0 %v1782_v37  ;;  %v1996_v36 = vld [vmem:[#allocation5 + $0x28] sm:$0xf0]  ;;  %v1546_v37 = vor.u32 %v2023_v27, %v1545_v26  ;;  %v1857_v26 = vld [vmem:[#allocation5 + $0x368] sm:$0xf]  ;;  %v2101_v27 = vld [vmem:[#allocation5 + $0x370] sm:$0xf0] }
  0x5d   :  { %1032 = vmatpush.bf16.msra.mxu1 %v1878_v40  ;;  %v1533_v40 = vld [vmem:[#allocation5 + $0xe0] sm:$0xf]  ;;  %v1438_v43 = vor.u32 %v1996_v36, %v1437_v35  ;;  %v2050_v33 = vld [vmem:[#allocation5 + $0x1d8] sm:$0xf0]  ;;  %v1749_v34 = vld [vmem:[#allocation5 + $0x290] sm:$0xf] }
  0x5e   :  { %1046 = vmatpush.bf16.msra.mxu2 %v1498_v41  ;;  %v2020_v41 = vld [vmem:[#allocation5 + $0xe8] sm:$0xf0]  ;;  %v2074_v35 = vld [vmem:[#allocation5 + $0x298] sm:$0xf0]  ;;  %v1845_v36 = vld [vmem:[#allocation5 + $0x350] sm:$0xf] }
  0x5f   :  { %v1641_v39 = vld [vmem:[#allocation5 + $0x1b8] sm:$0xf]  ;;  %v2095_v45 = vld [vmem:[#allocation5 + $0x340] sm:$0xf0]  ;;  %v2116_v6 = vld [vmem:[#allocation8 + $0x28] sm:$0xff] }
  0x60   :  { %1060 = vmatpush.bf16.msra.mxu3 %v1594_v48  ;;  %1019 = vmatpush.bf16.msra.mxu0 %v1770_v49  ;;  %v1993_v48 = vld [vmem:[#allocation5 + $0x10] sm:$0xf0]  ;;  %v1701_v49 = vld [vmem:[#allocation5 + $0x230] sm:$0xf]  ;;  %v1833_v44 = vld [vmem:[#allocation5 + $0x338] sm:$0xf] }
  0x61   :  { %1033 = vmatpush.bf16.msra.mxu1 %v1866_v53  ;;  %v2086_v53 = vld [vmem:[#allocation5 + $0x2f8] sm:$0xf0]  ;;  %v1426_v59 = vor.u32 %v1993_v48, %v1425_v47  ;;  %v1629_v48 = vld [vmem:[#allocation5 + $0x1a0] sm:$0xf]  ;;  %v2117_v5 = vld [vmem:[#allocation8 + $0x30] sm:$0xff] }
  0x62   :  { %1047 = vmatpush.bf16.msra.mxu2 %v1486_v54  ;;  %v1534_v54 = vor.u32 %v2020_v41, %v1533_v40  ;;  %v1798_v63 = vor.u32 %v2086_v53, %v1797_v51  ;;  %v2047_v41 = vld [vmem:[#allocation5 + $0x1c0] sm:$0xf0]  ;;  %v1725_v51 = vld [vmem:[#allocation5 + $0x260] sm:$0xf]  ;;  %v2068_v53 = vld [vmem:[#allocation5 + $0x268] sm:$0xf0] }
  0x63   :  { %v1642_v46 = vor.u32 %v2047_v41, %v1641_v39 }
  0x64   :  { %1061 = vmatpush.bf16.msra.mxu3 %v1582_v61  ;;  %1020 = vmatpush.bf16.msra.mxu0 %v1758_v62  ;;  %v2017_v61 = vld [vmem:[#allocation5 + $0xd0] sm:$0xf0]  ;;  %v1702_v62 = vor.u32 %v2062_v50, %v1701_v49  ;;  %v1834_v49 = vor.u32 %v2095_v45, %v1833_v44  ;;  %v2044_v50 = vld [vmem:[#allocation5 + $0x1a8] sm:$0xf0]  ;;  %v2134_v45 = vld [vmem:[#allocation8 + $0xb8] sm:$0xff] }
  0x65   :  { %1034 = vmatpush.bf16.msra.mxu1 %v1854_v1  ;;  %v1894_v1 = vor.u32 %v2110_v57, %v1893_v56  ;;  %v1522_v7 = vor.u32 %v2017_v61, %v1521_v60  ;;  %v1630_v56 = vor.u32 %v2044_v50, %v1629_v48  ;;  %v1726_v57 = vor.u32 %v2068_v53, %v1725_v51  ;;  %v2041_v60 = vld [vmem:[#allocation5 + $0x190] sm:$0xf0]  ;;  %v1713_v61 = vld [vmem:[#allocation5 + $0x248] sm:$0xf]  ;;  %v2132_v51 = vld [vmem:[#allocation8 + $0xa8] sm:$0xff] }
  0x66   :  { %1048 = vmatpush.bf16.msra.mxu2 %v1474_v2  ;;  %v2059_v2 = vld [vmem:[#allocation5 + $0x220] sm:$0xf0] }
  0x67   :  { %v1690_v8 = vor.u32 %v2059_v2, %v1689_v0  ;;  %v2089_v0 = vld [vmem:[#allocation5 + $0x310] sm:$0xf0] }
  0x68   :  { %1062 = vmatpush.bf16.msra.mxu3 %v1570_v9  ;;  %1021 = vmatpush.bf16.msra.mxu0 %v1746_v10  ;;  %v1786_v9 = vor.u32 %v2083_v4, %v1785_v3  ;;  %v1677_v10 = vld [vmem:[#allocation5 + $0x200] sm:$0xf] }
  0x69   :  { %1035 = vmatpush.bf16.msra.mxu1 %v1842_v13  ;;  %v1773_v13 = vld [vmem:[#allocation5 + $0x2c0] sm:$0xf]  ;;  %v1678_v19 = vor.u32 %v2056_v12, %v1677_v10  ;;  %v2112_v10 = vld [vmem:[#allocation8 + $0x8] sm:$0xff] }
  0x6a   :  { %1049 = vmatpush.bf16.msra.mxu2 %v1462_v16  ;;  %v2080_v16 = vld [vmem:[#allocation5 + $0x2c8] sm:$0xf0]  ;;  %v2118_v4 = vld [vmem:[#allocation8 + $0x38] sm:$0xff] }
  0x6b   :  { %v1774_v20 = vor.u32 %v2080_v16, %v1773_v13  ;;  %v2365_v12 = vld [vmem:[#allocation7] sm:$0x7]  ;;  %v2125_v16 = vld [vmem:[#allocation8 + $0x70] sm:$0xff] }
  0x6c   :  { %1063 = vmatpush.bf16.msra.mxu3 %v1558_v23  ;;  %1022 = vmatpush.bf16.msra.mxu0 %v1734_v24  ;;  %v2053_v23 = vld [vmem:[#allocation5 + $0x1f0] sm:$0xf0]  ;;  %v1761_v24 = vld [vmem:[#allocation5 + $0x2a8] sm:$0xf]  ;;  %v259_v13 = vperm.slane %v2365_v12, 0 }
  0x6d   :  { %1036 = vmatpush.bf16.msra.mxu1 %v1830_v28  ;;  %v1666_v28 = vor.u32 %v2053_v23, %v1665_v21 }
  0x6e   :  { %1050 = vmatpush.bf16.msra.mxu2 %v1450_v29  ;;  %v1762_v29 = vor.u32 %v2077_v25, %v1761_v24  ;;  %v2123_v24 = vld [vmem:[#allocation8 + $0x60] sm:$0xff] }
  0x70   :  { %1064 = vmatpush.bf16.msra.mxu3 %v1546_v37  ;;  %1023 = vmatpush.bf16.msra.mxu0 %v1722_v38  ;;  %v2098_v37 = vld [vmem:[#allocation5 + $0x358] sm:$0xf0]  ;;  %v1750_v38 = vor.u32 %v2074_v35, %v1749_v34  ;;  %v2121_v35 = vld [vmem:[#allocation8 + $0x50] sm:$0xff] }
  0x71   :  { %1037 = vmatpush.bf16.msra.mxu1 %v1818_v42  ;;  %v1846_v40 = vor.u32 %v2098_v37, %v1845_v36  ;;  %v1737_v42 = vld [vmem:[#allocation5 + $0x278] sm:$0xf] }
  0x72   :  { %1051 = vmatpush.bf16.msra.mxu2 %v1438_v43  ;;  %v2071_v43 = vld [vmem:[#allocation5 + $0x280] sm:$0xf0] }
  0x73   :  { %v1738_v47 = vor.u32 %v2071_v43, %v1737_v42  ;;  %v2119_v43 = vld [vmem:[#allocation8 + $0x40] sm:$0xff] }
  0x74   :  { %1065 = vmatpush.bf16.msra.mxu3 %v1534_v54  ;;  %1024 = vmatpush.bf16.msra.mxu0 %v1710_v55  ;;  %v1821_v54 = vld [vmem:[#allocation5 + $0x320] sm:$0xf]  ;;  %v2092_v55 = vld [vmem:[#allocation5 + $0x328] sm:$0xf0] }
  0x75   :  { %1038 = vmatpush.bf16.msra.mxu1 %v1806_v58  ;;  %v1617_v58 = vld [vmem:[#allocation5 + $0x188] sm:$0xf] }
  0x76   :  { %1052 = vmatpush.bf16.msra.mxu2 %v1426_v59  ;;  %v1822_v59 = vor.u32 %v2092_v55, %v1821_v54 }
  0x77   :  { %1025 = vmatmul.bf16.vlgmr.msra.gmra.mxu0 %v2345_v15 }
  0x78   :  { %1073 = vmatpush.bf16.msrb.mxu0 %v1702_v62  ;;  %1039 = vmatmul.bf16.vlgmr.msra.gmra.mxu1 %v2352_v31  ;;  %v2065_v62 = vld [vmem:[#allocation5 + $0x250] sm:$0xf0] }
  0x79   :  { %1087 = vmatpush.bf16.msrb.mxu1 %v1798_v63  ;;  %1066 = vmatpush.bf16.msra.mxu3 %v1522_v7  ;;  %v1809_v63 = vld [vmem:[#allocation5 + $0x308] sm:$0xf]  ;;  %v1714_v2 = vor.u32 %v2065_v62, %v1713_v61 }
  0x7a   :  { %1101 = vmatpush.bf16.msrb.mxu2 %v1894_v1  ;;  %v1618_v1 = vor.u32 %v2041_v60, %v1617_v58  ;;  %v1810_v3 = vor.u32 %v2089_v0, %v1809_v63  ;;  %v2115_v7 = vld [vmem:[#allocation8 + $0x20] sm:$0xff]  ;;  %v2130_v0 = vld [vmem:[#allocation8 + $0x98] sm:$0xff] }
  0x7b   :  { %1053 = vmatmul.bf16.vlgmr.msra.gmra.mxu2 %v2340_v52  ;;  %v1858_v52 = vor.u32 %v2101_v27, %v1857_v26  ;;  %v2131_v58 = vld [vmem:[#allocation8 + $0xa0] sm:$0xff] }
  0x7c   :  { %1074 = vmatpush.bf16.msrb.mxu0 %v1690_v8  ;;  %1067 = vmatmul.bf16.vlgmr.msra.gmra.mxu3 %v2349_v30  ;;  %v1654_v30 = vor.u32 %v2050_v33, %v1653_v32  ;;  %v2114_v8 = vld [vmem:[#allocation8 + $0x18] sm:$0xff] }
  0x7d   :  { %1088 = vmatpush.bf16.msrb.mxu1 %v1786_v9  ;;  %1320 = vmatpush.bf16.msrb.mxu3 %v2118_v4  ;;  %v2113_v9 = vld [vmem:[#allocation8 + $0x10] sm:$0xff] }
  0x7e   :  { %1102 = vmatpush.bf16.msrb.mxu2 %v1882_v11 }
  0x80   :  { %1075 = vmatpush.bf16.msrb.mxu0 %v1678_v19  ;;  %v2124_v19 = vld [vmem:[#allocation8 + $0x68] sm:$0xff] }
  0x81   :  { %1089 = vmatpush.bf16.msrb.mxu1 %v1774_v20  ;;  %1321 = vmatpush.bf16.msrb.mxu3 %v2117_v5 }
  0x82   :  { %1103 = vmatpush.bf16.msrb.mxu2 %v1870_v22 }
  0x84   :  { %1076 = vmatpush.bf16.msrb.mxu0 %v1666_v28 }
  0x85   :  { %1090 = vmatpush.bf16.msrb.mxu1 %v1762_v29  ;;  %1322 = vmatpush.bf16.msrb.mxu3 %v2116_v6  ;;  %v2122_v29 = vld [vmem:[#allocation8 + $0x58] sm:$0xff] }
  0x86   :  { %1104 = vmatpush.bf16.msrb.mxu2 %v1858_v52 }
  0x88   :  { %1077 = vmatpush.bf16.msrb.mxu0 %v1654_v30  ;;  %v2120_v30 = vld [vmem:[#allocation8 + $0x48] sm:$0xff] }
  0x89   :  { %1091 = vmatpush.bf16.msrb.mxu1 %v1750_v38  ;;  %1323 = vmatpush.bf16.msrb.mxu3 %v2115_v7 }
  0x8a   :  { %1105 = vmatpush.bf16.msrb.mxu2 %v1846_v40 }
  0x8c   :  { %1078 = vmatpush.bf16.msrb.mxu0 %v1642_v46  ;;  %v260_v46 = vperm.slane %v2365_v12, 1 }
  0x8d   :  { %1092 = vmatpush.bf16.msrb.mxu1 %v1738_v47  ;;  %1324 = vmatpush.bf16.msrb.mxu3 %v2114_v8  ;;  %v2133_v47 = vld [vmem:[#allocation8 + $0xb0] sm:$0xff] }
  0x8e   :  { %1106 = vmatpush.bf16.msrb.mxu2 %v1834_v49 }
  0x90   :  { %1079 = vmatpush.bf16.msrb.mxu0 %v1630_v56 }
  0x91   :  { %1093 = vmatpush.bf16.msrb.mxu1 %v1726_v57  ;;  %1325 = vmatpush.bf16.msrb.mxu3 %v2113_v9  ;;  %v2128_v9 = vld [vmem:[#allocation8 + $0x88] sm:$0xff] }
  0x92   :  { %1107 = vmatpush.bf16.msrb.mxu2 %v1822_v59 }
  0x94   :  { %1080 = vmatpush.bf16.msrb.mxu0 %v1618_v1 }
  0x95   :  { %1094 = vmatpush.bf16.msrb.mxu1 %v1714_v2  ;;  %1326 = vmatpush.bf16.msrb.mxu3 %v2112_v10 }
  0x96   :  { %1108 = vmatpush.bf16.msrb.mxu2 %v1810_v3  ;;  %v2129_v3 = vld [vmem:[#allocation8 + $0x90] sm:$0xff] }
  0x97   :  { %1081 = vmatmul.bf16.vlgmr.msrb.gmra.mxu0 %v2343_v14  ;;  %v2111_v14 = vld [vmem:[#allocation8] sm:$0xff] }
  0x98   :  { %1095 = vmatmul.bf16.vlgmr.msrb.gmra.mxu1 %v2345_v15  ;;  %v2126_v15 = vld [vmem:[#allocation8 + $0x78] sm:$0xff] }
  0x99   :  { %1109 = vmatmul.bf16.vlgmr.msrb.gmra.mxu2 %v2352_v31  ;;  %1327 = vmatpush.bf16.msrb.mxu3 %v2111_v14  ;;  %v2127_v14 = vld [vmem:[#allocation8 + $0x80] sm:$0xff] }
  0x9a   :  { %1334 = vmatpush.bf16.msra.mxu0 %v2126_v15  ;;  %1348 = vmatpush.bf16.msra.mxu1 %v2134_v45 }
  0x9e   :  { %1335 = vmatpush.bf16.msra.mxu0 %v2125_v16  ;;  %1349 = vmatpush.bf16.msra.mxu1 %v2133_v47 }
  0xa2   :  { %1336 = vmatpush.bf16.msra.mxu0 %v2124_v19  ;;  %1350 = vmatpush.bf16.msra.mxu1 %v2132_v51 }
  0xa6   :  { %1337 = vmatpush.bf16.msra.mxu0 %v2123_v24  ;;  %1351 = vmatpush.bf16.msra.mxu1 %v2131_v58 }
  0xaa   :  { %1338 = vmatpush.bf16.msra.mxu0 %v2122_v29  ;;  %1352 = vmatpush.bf16.msra.mxu1 %v2130_v0 }
  0xae   :  { %1339 = vmatpush.bf16.msra.mxu0 %v2121_v35  ;;  %1353 = vmatpush.bf16.msra.mxu1 %v2129_v3 }
  0xb2   :  { %1340 = vmatpush.bf16.msra.mxu0 %v2120_v30  ;;  %1354 = vmatpush.bf16.msra.mxu1 %v2128_v9  ;;  %v2148_v30 = vld [vmem:[%s2380_s4] ss:$0 sm:$0xff]  ;;  %s2295_s4 = smov [#allocation10]  }
  0xb3   :  { %s1398_s17 = sshll.u32 %s2295_s4, 4  ;;  %s1399_s17 = int_to_ptr.vmem [resolvable:$true] %s1398_s17 }
  0xb4   :  { %v914_v11 = vpop.f32.mrf.mxu0 }
  0xb5   :  { %v915_v18 = vadd.f32 %v914_v11, %v259_v13 }
  0xb6   :  { %1341 = vmatpush.bf16.msra.mxu0 %v2119_v43  ;;  %1355 = vmatpush.bf16.msra.mxu1 %v2127_v14 }
  0xb8   :  { %v928_v31 = vpop.f32.mrf.mxu1 }
  0xb9   :  { %v929_v23 = vadd.f32 %v928_v31, %v915_v18 }
  0xbc   :  { %v942_v17 = vpop.f32.mrf.mxu2  ;;  %v916_v20 = vpop.f32.mrf.mxu0 }
  0xbd   :  { %v917_v22 = vadd.f32 %v916_v20, %v259_v13  ;;  %v943_v26 = vadd.f32 %v942_v17, %v929_v23  ;;  %v261_v13 = vperm.slane %v2365_v12, 2 }
  0xbe   :  { %v956_v21 = vpop.f32.mrf.mxu3 }
  0xbf   :  { %v957_v52 = vadd.f32 %v956_v21, %v943_v26 }
  0xc0   :  { %v930_v25 = vpop.f32.mrf.mxu1 }
  0xc1   :  { %v931_v27 = vadd.f32 %v930_v25, %v917_v22 }
  0xc4   :  { %v944_v28 = vpop.f32.mrf.mxu2 }
  0xc5   :  { %v945_v33 = vadd.f32 %v944_v28, %v931_v27 }
  0xc6   :  { %v958_v34 = vpop.f32.mrf.mxu3 }
  0xc7   :  { %v959_v37 = vadd.f32 %v958_v34, %v945_v33 }
  0xd4   :  { %v970_v32 = vpop.f32.mrf.mxu0 }
  0xd5   :  { %v971_v36 = vadd.f32 %v970_v32, %v957_v52 }
  0xd7   :  { %v1115_v39 = vmax.f32 %v971_v36, 0.0  ;;  %v984_v41 = vpop.f32.mrf.mxu1 }
  0xd8   :  { %v985_v49 = vadd.f32 %v984_v41, %v260_v46 }
  0xdc   :  { %v972_v38 = vpop.f32.mrf.mxu0  ;;  %v998_v48 = vpop.f32.mrf.mxu2 }
  0xdd   :  { %v973_v40 = vadd.f32 %v972_v38, %v959_v37  ;;  %v999_v54 = vadd.f32 %v998_v48, %v985_v49 }
  0xde   :  { %v1012_v53 = vpop.f32.mrf.mxu3 }
  0xdf   :  { %v1118_v42 = vmax.f32 %v973_v40, 0.0  ;;  %v986_v50 = vpop.f32.mrf.mxu1  ;;  %v1013_v57 = vadd.f32 %v1012_v53, %v999_v54 }
  0xe0   :  { %v987_v55 = vadd.f32 %v986_v50, %v260_v46 }
  0xe1   :  { %v1121_v44 = vpack.c.bf16 %v1118_v42, %v1115_v39 }
  0xe3   :  { %1328 = vmatmul.bf16.vlgmr.msrb.gmra.mxu3 %v1121_v44 }
  0xe4   :  { %v1000_v56 = vpop.f32.mrf.mxu2 }
  0xe5   :  { %v1001_v61 = vadd.f32 %v1000_v56, %v987_v55 }
  0xe6   :  { %v1014_v62 = vpop.f32.mrf.mxu3 }
  0xe7   :  { %v1015_v1 = vadd.f32 %v1014_v62, %v1001_v61 }
  0xf4   :  { %v1026_v59 = vpop.f32.mrf.mxu0 }
  0xf5   :  { %v1040_v60 = vpop.f32.mrf.mxu1  ;;  %v1027_v63 = vadd.f32 %v1026_v59, %v1013_v57 }
  0xf7   :  { %v1041_v2 = vadd.f32 %v1040_v60, %v1027_v63 }
  0xf9   :  { %v1116_v7 = vmax.f32 %v1041_v2, 0.0 }
  0xfc   :  { %v1028_v4 = vpop.f32.mrf.mxu0 }
  0xfd   :  { %v1029_v5 = vadd.f32 %v1028_v4, %v1015_v1  ;;  %v1042_v6 = vpop.f32.mrf.mxu1 }
  0xfe   :  { %v1054_v15 = vpop.f32.mrf.mxu2 }
  0xff   :  { %v1043_v8 = vadd.f32 %v1042_v6, %v1029_v5  ;;  %v1068_v31 = vpop.f32.mrf.mxu3  ;;  %v1055_v18 = vadd.f32 %v1054_v15, %v261_v13 }
 0x101   :  { %v1119_v10 = vmax.f32 %v1043_v8, 0.0  ;;  %v1069_v22 = vadd.f32 %v1068_v31, %v1055_v18 }
 0x103   :  { %v1122_v11 = vpack.c.bf16 %v1119_v10, %v1116_v7 }
 0x105   :  { %1342 = vmatmul.bf16.vlgmr.msra.gmra.mxu0 %v1122_v11 }
 0x106   :  { %v1056_v16 = vpop.f32.mrf.mxu2 }
 0x107   :  { %v1057_v20 = vadd.f32 %v1056_v16, %v261_v13  ;;  %v1070_v21 = vpop.f32.mrf.mxu3 }
 0x109   :  { %v1071_v24 = vadd.f32 %v1070_v21, %v1057_v20 }
 0x114   :  { %v1082_v17 = vpop.f32.mrf.mxu0 }
 0x115   :  { %v1096_v19 = vpop.f32.mrf.mxu1  ;;  %v1083_v25 = vadd.f32 %v1082_v17, %v1069_v22 }
 0x117   :  { %v1097_v28 = vadd.f32 %v1096_v19, %v1083_v25 }
 0x11c   :  { %v1110_v23 = vpop.f32.mrf.mxu2  ;;  %v1084_v26 = vpop.f32.mrf.mxu0 }
 0x11d   :  { %v1085_v27 = vadd.f32 %v1084_v26, %v1071_v24  ;;  %v1098_v29 = vpop.f32.mrf.mxu1  ;;  %v1111_v32 = vadd.f32 %v1110_v23, %v1097_v28 }
 0x11f   :  { %v1099_v52 = vadd.f32 %v1098_v29, %v1085_v27  ;;  %v1117_v35 = vmax.f32 %v1111_v32, 0.0 }
 0x124   :  { %v1112_v33 = vpop.f32.mrf.mxu2 }
 0x125   :  { %v1113_v34 = vadd.f32 %v1112_v33, %v1099_v52 }
 0x127   :  { %v1120_v12 = vmax.f32 %v1113_v34, 0.0 }
 0x129   :  { %v1123_v36 = vpack.c.bf16 %v1120_v12, %v1117_v35 }
 0x12b   :  { %1356 = vmatmul.bf16.vlgmr.msra.gmra.mxu1 %v1123_v36 }
 0x166   :  { %v1329_v37 = vpop.f32.mrf.mxu3 }
 0x167   :  { %v1330_v39 = vadd.f32 %v2148_v30, %v1329_v37 }
 0x16e   :  { %v1331_v43 = vpop.f32.mrf.mxu3 }
 0x16f   :  { %v1332_v46 = vadd.f32 %v2148_v30, %v1331_v43 }
 0x182   :  { %v1343_v38 = vpop.f32.mrf.mxu0 }
 0x183   :  { %v1344_v40 = vadd.f32 %v1343_v38, %v1330_v39 }
 0x18a   :  { %v1345_v45 = vpop.f32.mrf.mxu0 }
 0x18b   :  { %v1346_v48 = vadd.f32 %v1345_v45, %v1332_v46 }
 0x1a8   :  { %v1357_v41 = vpop.f32.mrf.mxu1 }
 0x1a9   :  { %v1358_v42 = vadd.f32 %v1357_v41, %v1344_v40 }
 0x1ab   :  { %v1364_v44 = vand.u32 2147483647, %v1358_v42  ;;  %v1362_v3 = vmin.f32 %v1358_v42, 0.0 }
 0x1ad   :  { %v1366_v47 = vsub.f32 0.0, %v1364_v44 }
 0x1af   :  { %v1368_v49 = vmul.f32 1.442695, %v1366_v47 }
 0x1b0   :  { %v1359_v50 = vpop.f32.mrf.mxu1 }
 0x1b1   :  { %2149 = vpow2.f32 %v1368_v49  ;;  %v1360_v51 = vadd.f32 %v1359_v50, %v1346_v48 }
 0x1b3   :  { %v1365_v53 = vand.u32 2147483647, %v1360_v51  ;;  %v1363_v11 = vmin.f32 %v1360_v51, 0.0 }
 0x1b5   :  { %v1367_v54 = vsub.f32 0.0, %v1365_v53 }
 0x1b7   :  { %v2150_v55 = vpop.eup %2149  ;;  %v1370_v56 = vmul.f32 1.442695, %v1367_v54 }
 0x1b8   :  { %v1372_v57 = vadd.f32 1.0, %v2150_v55  ;;  %v1375_v58 = vmul.f32 -0.5, %v2150_v55  ;;  %v1378_v60 = vand.u32 2147483647, %v2150_v55 }
 0x1b9   :  { %2151 = vpow2.f32 %v1370_v56 }
 0x1ba   :  { %2153 = vlog2.f32 %v1372_v57  ;;  %v1376_v59 = vadd.f32 1.0, %v1375_v58  ;;  %vm1379_vm0 = vcmp.lt.f32.partialorder %v1378_v60, 0.0004427343 }
 0x1bc   :  { %v1377_v1 = vmul.f32 %v2150_v55, %v1376_v59 }
 0x1bf   :  { %v2152_v61 = vpop.eup %2151 }
 0x1c0   :  { %v2154_v62 = vpop.eup %2153  ;;  %v1381_v63 = vadd.f32 1.0, %v2152_v61  ;;  %v1384_v2 = vmul.f32 -0.5, %v2152_v61  ;;  %v1387_v7 = vand.u32 2147483647, %v2152_v61 }
 0x1c1   :  { %v1374_v0 = vmul.f32 0.6931472, %v2154_v62 }
 0x1c2   :  { %2155 = vlog2.f32 %v1381_v63  ;;  %v1385_v6 = vadd.f32 1.0, %v1384_v2  ;;  %vm1388_vm1 = vcmp.lt.f32.partialorder %v1387_v7, 0.0004427343 }
 0x1c3   :  { %v1380_v4 = vsel %vm1379_vm0, %v1377_v1, %v1374_v0 }
 0x1c4   :  { %v1390_v5 = vsub.f32 %v1362_v3, %v1380_v4  ;;  %v1386_v10 = vmul.f32 %v2152_v61, %v1385_v6 }
 0x1c6   :  { %1392 = vst [vmem:[#allocation10] sm:$0xff] %v1390_v5 }
 0x1c8   :  { %v2156_v8 = vpop.eup %2155 }
 0x1c9   :  { %v1383_v9 = vmul.f32 0.6931472, %v2156_v8 }
 0x1cb   :  { %v1389_v14 = vsel %vm1388_vm1, %v1386_v10, %v1383_v9 }
 0x1cc   :  { %v1391_v15 = vsub.f32 %v1363_v11, %v1389_v14 }
 0x1ce   :  { %1393 = vst [vmem:[#allocation10 + $0x8] sm:$0xff] %v1391_v15 }
 0x1cf   :  { %1406 = dma.vmem_to_hbm [thread:$0]  %s1399_s17, 256, %s1401_s20, [#allocation4], %s2296_s21, %s2296_s21, %s2297_s22  }
 0x1d0   :  { %2283 = dma.done.wait [#allocation4], 256  }
 0x1d1   :  { %2284 = vsyncadd [#allocation4], 4294967040 }
 0x1d2   :  { %1411 = vsyncpa [#allocation3], 1 }
 0x1d3   :  { %1412 = vsyncpa [#allocation6], 1 }
 0x1d4   :  { %1413 = vsyncpa [#allocation9], 1 }
 0x1d5   :  { %1414 = vsyncpa [#allocation4], 1 }

</bundles_post_ra>
